<compile_context>
chip_gen: v7x
topology: tpu7x:2x2x1
jax: 0.10.0
libtpu: 0.0.40
codegen_flags: <defaults>
</compile_context>

<pallas_src>
import jax
import jax.numpy as jnp
from jax.experimental import pallas as pl
from jax.experimental.pallas import tpu as pltpu

ATT_DIM = 256
SCALE = ATT_DIM ** (-0.5)


def _make_attention_kernel(BB, T, T_pad, D, use_bf16_matmul):
    def kernel(x_ref, w_ref, v_ref, o_ref):
        # x_ref: (BB, T_pad, D) f32; w_ref: (D, ATT_DIM); v_ref: (1, ATT_DIM) pre-scaled
        # o_ref: (BB, D) f32
        x = x_ref[...]                                   # (BB, T_pad, D)
        xf = x.reshape(BB * T_pad, D)                    # tile aligned: T_pad%8==0, D%128==0
        xm = xf.astype(jnp.bfloat16) if use_bf16_matmul else xf
        # single MXU matmul over the whole batch block: (BB*T_pad, D) @ (D, ATT_DIM)
        e = jnp.tanh(jnp.dot(xm, w_ref[...],
                             preferred_element_type=jnp.float32))     # (BB*T_pad, A)
        # score: VPU mul + lane reduce; 1/sqrt(att_dim) already folded into v
        s = jnp.sum(e * v_ref[...], axis=-1, keepdims=True)           # (BB*T_pad, 1)
        n1 = jnp.exp(s.reshape(BB, T_pad, 1))            # torch-exact: no max subtraction
        if T_pad != T:
            # zero the contribution of padded sequence rows (denominator + output)
            t_idx = jax.lax.broadcasted_iota(jnp.int32, (BB, T_pad, 1), 1)
            n1 = jnp.where(t_idx < T, n1, 0.0)
        # deferred normalization: unnormalized weighted sum on VPU/XLU (keeps the
        # MXU free), then a single (BB, D)/(BB, 1) divide.
        n2 = jnp.sum(n1, axis=1)                         # (BB, 1)
        out_un = jnp.sum(n1 * x, axis=1)                 # (BB, D)
        o_ref[...] = out_un / n2
    return kernel


def attention_forward(x_nct, W, V, *, block_b=None, use_bf16_matmul=False):
    """x_nct: (B, 256, T); W: (256, 256); V: (256, 1). Returns (B, 256) float32."""
    B, D, T = x_nct.shape
    assert D == 256 and W.shape == (D, ATT_DIM) and V.shape == (ATT_DIM, 1)

    # layout glue: NCT -> (B, T, D). Negligible at small T; see TODO above for large T.
    x = jnp.transpose(x_nct, (0, 2, 1)).astype(jnp.float32)

    # pad T to a sublane multiple so the in-kernel reshape is tile aligned;
    # padded rows are masked out of the softmax inside the kernel.
    T_pad = ((T + 7) // 8) * 8
    if T_pad != T:
        x = jnp.pad(x, ((0, 0), (0, T_pad - T), (0, 0)))

    # generation-aware caps: v7x has 64 MiB physical VMEM (32 MiB scoped default)
    # -> smaller per-step x block & limit; v5e/v6e have 128 MiB -> fatter tiles.
    try:
        vmem_cap = int(getattr(pltpu.get_tpu_info(), "vmem_capacity_bytes", 0)) or (64 << 20)
    except Exception:
        vmem_cap = 64 << 20                              # conservative fallback
    small_vmem = vmem_cap <= (64 << 20)
    x_blk_cap = (5 << 20) if small_vmem else (14 << 20)
    vmem_limit_cap = (40 << 20) if small_vmem else (96 << 20)

    # batch blocking: target BB*T_pad ~ 2048 matmul rows (x blocks >= ~1-4 MiB)
    # so fixed per-step cost is amortised, subject to the per-generation VMEM cap.
    if block_b is None:
        block_b = max(8, pl.cdiv(2048, T_pad))
    bb_cap = max(1, x_blk_cap // (T_pad * D * 4))
    BB = max(1, min(block_b, bb_cap, B))
    if BB >= B:
        BB, nb = B, 1                                    # single step, block == array
    else:
        BB = max(8, (BB // 8) * 8)                       # sublane-dense output tiles
        nb = pl.cdiv(B, BB)
        # prefer an even number of grid steps so the "parallel" batch axis
        # load-balances across v7x's two TensorCores (harmless on 1-TC chips).
        if nb > 1 and nb % 2 == 1:
            bb_alt = max(8, ((pl.cdiv(B, nb + 1) + 7) // 8) * 8)
            if pl.cdiv(B, bb_alt) % 2 == 0:
                BB = bb_alt
                nb = pl.cdiv(B, bb_alt)

    # pad batch to a multiple of BB (padded rows are computed and sliced off)
    Bp = nb * BB
    if Bp != B:
        x = jnp.pad(x, ((0, Bp - B), (0, 0), (0, 0)))

    # fold the 1/sqrt(att_dim) scale into V (one fewer per-row VPU multiply)
    v_scaled = (jnp.transpose(V, (1, 0)) * SCALE).astype(jnp.float32)   # (1, ATT_DIM)
    w_dtype = jnp.bfloat16 if use_bf16_matmul else jnp.float32
    Wd = W.astype(w_dtype)

    # scoped-VMEM budget: double-buffered x/out blocks + resident W/V + the
    # tanh(x@W) intermediate (same size as the x block) + exp/temp headroom;
    # raised past v5e's 16 MiB scoped default, capped per generation above.
    x_blk = BB * T_pad * D * 4
    o_blk = BB * D * 4
    resident = D * ATT_DIM * (2 if use_bf16_matmul else 4) + ATT_DIM * 4
    interm = 2 * x_blk
    vmem_limit = int(min(max(2 * (x_blk + o_blk) + resident + interm + (4 << 20),
                             20 << 20),
                         vmem_limit_cap))

    kernel = _make_attention_kernel(BB, T, T_pad, D, use_bf16_matmul)
    out = pl.pallas_call(
        kernel,
        out_shape=jax.ShapeDtypeStruct((Bp, D), jnp.float32),
        grid_spec=pltpu.PrefetchScalarGridSpec(
            num_scalar_prefetch=0,
            grid=(nb,),
            in_specs=[
                pl.BlockSpec((BB, T_pad, D), lambda b: (b, 0, 0)),   # x: BB batches / step
                pl.BlockSpec((D, ATT_DIM), lambda b: (0, 0)),        # W: resident
                pl.BlockSpec((1, ATT_DIM), lambda b: (0, 0)),        # V^T * scale: resident
            ],
            out_specs=pl.BlockSpec((BB, D), lambda b: (b, 0)),
        ),
        compiler_params=pltpu.CompilerParams(
            dimension_semantics=("parallel",),
            vmem_limit_bytes=vmem_limit,
        ),
    )(x, Wd, v_scaled)
    return out[:B]


def attention_ref(x_nct, W, V):
    """Pure-JAX reference mirroring the PyTorch forward exactly."""
    x = jnp.transpose(x_nct, (0, 2, 1))                  # (B, T, 256)
    e = jnp.matmul(x, W)                                 # (B, T, 256)
    e = jnp.matmul(jnp.tanh(e), V) * SCALE               # (B, T, 1)
    n1 = jnp.exp(e)
    n2 = jnp.sum(jnp.exp(e), axis=1, keepdims=True)
    alpha = n1 / n2
    return jnp.sum(alpha * x, axis=1)                    # (B, 256)


if __name__ == "__main__":
    key = jax.random.PRNGKey(0)
    k_x, k_w, k_v = jax.random.split(key, 3)

    B, T = 2, 8                                # small seq; feature dim fixed at 256 by module
    x = jax.random.normal(k_x, (B, 256, T), dtype=jnp.float32)        # (B, C=256, T)
    W = jax.random.normal(k_w, (256, ATT_DIM), dtype=jnp.float32)     # torch.randn(256, 256)
    V = jax.random.normal(k_v, (ATT_DIM, 1), dtype=jnp.float32)       # torch.randn(256, 1)

    out = jax.block_until_ready(attention_forward(x, W, V))
    ref = attention_ref(x, W, V)
    assert out.shape == (B, 256)
    assert jnp.allclose(out, ref, atol=1e-4, rtol=1e-4), "mismatch vs reference"

    print("KERNEL_OK")
</pallas_src>

<mosaic_0001>
module attributes {stable_mosaic.version = 11 : i64} {
  func.func @kernel(%arg0: i32, %arg1: memref<2x8x256xf32, #tpu.memory_space<vmem>>, %arg2: memref<256x256xf32, #tpu.memory_space<vmem>>, %arg3: memref<1x256xf32, #tpu.memory_space<vmem>>, %arg4: memref<2x256xf32, #tpu.memory_space<vmem>>) attributes {dimension_semantics = [#tpu.dimension_semantics<parallel>], iteration_bounds = array<i64: 1>, scalar_prefetch = 0 : i64, scratch_operands = 0 : i64, tpu.core_type = #tpu.core_type<tc>, window_params = [{transform_indices = @transform_0, window_bounds = array<i64: 2, 8, 256>}, {pipeline_mode = #tpu.pipeline_mode<synchronous>, transform_indices = @transform_1, window_bounds = array<i64: 256, 256>}, {pipeline_mode = #tpu.pipeline_mode<synchronous>, transform_indices = @transform_2, window_bounds = array<i64: 1, 256>}, {transform_indices = @transform_3, window_bounds = array<i64: 2, 256>}]} {
    %c0 = arith.constant 0 : index
    %c0_0 = arith.constant 0 : index
    %c0_1 = arith.constant 0 : index
    %0 = vector.load %arg1[%c0, %c0_0, %c0_1] : memref<2x8x256xf32, #tpu.memory_space<vmem>>, vector<2x8x256xf32>
    %1 = vector.shape_cast %0 : vector<2x8x256xf32> to vector<16x256xf32>
    %c0_2 = arith.constant 0 : index
    %c0_3 = arith.constant 0 : index
    %2 = vector.load %arg2[%c0_2, %c0_3] : memref<256x256xf32, #tpu.memory_space<vmem>>, vector<256x256xf32>
    %cst = arith.constant dense<0.000000e+00> : vector<16x256xf32>
    %3 = tpu.matmul %1, %2, %cst {dimension_numbers = #tpu.dot_dimension_numbers<[1], [0], [0], [1], [0, 0, 1, 1], [], []>} : vector<16x256xf32>, vector<256x256xf32>, vector<16x256xf32> -> vector<16x256xf32>
    %4 = math.tanh %3 : vector<16x256xf32>
    %c0_4 = arith.constant 0 : index
    %c0_5 = arith.constant 0 : index
    %5 = vector.load %arg3[%c0_4, %c0_5] : memref<1x256xf32, #tpu.memory_space<vmem>>, vector<1x256xf32>
    %6 = vector.broadcast %5 : vector<1x256xf32> to vector<16x256xf32>
    %7 = arith.mulf %4, %6 : vector<16x256xf32>
    %cst_6 = arith.constant dense<0.000000e+00> : vector<16xf32>
    %8 = vector.multi_reduction <add>, %7, %cst_6 [1] : vector<16x256xf32> to vector<16xf32>
    %9 = vector.shape_cast %8 : vector<16xf32> to vector<16x1xf32>
    %10 = vector.shape_cast %9 : vector<16x1xf32> to vector<2x8x1xf32>
    %11 = math.exp %10 : vector<2x8x1xf32>
    %cst_7 = arith.constant dense<0.000000e+00> : vector<2x1xf32>
    %12 = vector.multi_reduction <add>, %11, %cst_7 [1] : vector<2x8x1xf32> to vector<2x1xf32>
    %13 = vector.broadcast %11 : vector<2x8x1xf32> to vector<2x8x256xf32>
    %14 = arith.mulf %13, %0 : vector<2x8x256xf32>
    %cst_8 = arith.constant dense<0.000000e+00> : vector<2x256xf32>
    %15 = vector.multi_reduction <add>, %14, %cst_8 [1] : vector<2x8x256xf32> to vector<2x256xf32>
    %16 = vector.broadcast %12 : vector<2x1xf32> to vector<2x256xf32>
    %17 = arith.divf %15, %16 : vector<2x256xf32>
    %c0_9 = arith.constant 0 : index
    %c0_10 = arith.constant 0 : index
    %18 = vector.load %arg4[%c0_9, %c0_10] : memref<2x256xf32, #tpu.memory_space<vmem>>, vector<2x256xf32>
    tpu.vector_store %arg4[%c0_9, %c0_10], %17 {strides = array<i32>} : memref<2x256xf32, #tpu.memory_space<vmem>>, vector<2x256xf32>,
    return
  }
  func.func @transform_0(%arg0: i32) -> (i32, i32, i32) {
    %c0_i32 = arith.constant 0 : i32
    %c0_i32_0 = arith.constant 0 : i32
    %c0_i32_1 = arith.constant 0 : i32
    return %arg0, %c0_i32, %c0_i32_0 : i32, i32, i32
  }
  func.func @transform_1(%arg0: i32) -> (i32, i32) {
    %c0_i32 = arith.constant 0 : i32
    %c0_i32_0 = arith.constant 0 : i32
    %c0_i32_1 = arith.constant 0 : i32
    return %c0_i32, %c0_i32_0 : i32, i32
  }
  func.func @transform_2(%arg0: i32) -> (i32, i32) {
    %c0_i32 = arith.constant 0 : i32
    %c0_i32_0 = arith.constant 0 : i32
    %c0_i32_1 = arith.constant 0 : i32
    return %c0_i32, %c0_i32_0 : i32, i32
  }
  func.func @transform_3(%arg0: i32) -> (i32, i32) {
    %c0_i32 = arith.constant 0 : i32
    %c0_i32_0 = arith.constant 0 : i32
    return %arg0, %c0_i32 : i32, i32
  }
}

</mosaic_0001>

<bundles_post_ra>
// kernel: tpu_custom_call.1
= control target key start
LH: loop header
LB: loop body
LE: loop exit
PB: predicated region body
PF: predicated region fallthrough
CT: control target
= control target key end

     0   :  { %8 = vsyncpa [#allocation3], 0  ;;  %s583_s0 = inlined_call_operand.hbm [shape: f32[2,8,256], index: 0, kind: input, shape index: {}]   ;;  %s584_s1 = inlined_call_operand.hbm [shape: f32[256,256], index: 1, kind: input, shape index: {}]   ;;  %s585_s2 = inlined_call_operand.vmem [shape: f32[1,256], index: 2, kind: input, shape index: {}]   ;;  %s586_s3 = inlined_call_operand.hbm [shape: f32[2,256], index: 3, kind: output, shape index: {}]  }
   0x1   :  { %9 = vsyncpa [#allocation6], 0 }
   0x2   :  { %10 = vsyncpa [#allocation4], 0  ;;  %s505_s12 = smov [#allocation2]   ;;  %s433_s16 = scalar_lea.hbm %s583_s0, 512 }
   0x3   :  { %s16_s13 = sshll.u32 %s505_s12, 4  ;;  %p434_p0 = scmp.ne.s32.totalorder %s583_s0, %s433_s16  ;;  %s17_s13 = int_to_ptr.vmem [resolvable:$true] %s16_s13 }
   0x4   :  { %p437_p1 = scmp.lt.u32.totalorder %s433_s16, %s583_s0 }
   0x6   :  { %p439_p2 = pnand %p437_p1, %p434_p0 }
   0x8   :  { %442 = shalt.err (!%p439_p2)
}
   0x9   :  { %s443_s21 = scalar_lea.vmem %s17_s13, 512  ;;  %p448_p4 = scmp.lt.s32.totalorder %s17_s13, %s17_s13 }
   0xa   :  { %p444_p3 = scmp.ne.s32.totalorder %s17_s13, %s443_s21  ;;  %p449_p5 = scmp.lt.s32.totalorder %s443_s21, %s443_s21 }
   0xc   :  { %p450_p6 = por %p449_p5, %p448_p4 }
   0xe   :  { %p451_p7 = pnand %p450_p6, %p444_p3 }
  0x10   :  { %454 = shalt.err (!%p451_p7)
}
  0x11   :  { %s506_s22 = smov 256   ;;  %s507_s23 = smov 16  }
  0x12   :  { %22 = dma.hbm_to_vmem [thread:$0]  %s583_s0, 512, %s17_s13, [#allocation3], %s506_s22, %s506_s22, %s507_s23  }
  0x13   :  { %s508_s26 = smov [#allocation5]   ;;  %s455_s30 = scalar_lea.hbm %s584_s1, 8192 }
  0x14   :  { %s28_s27 = sshll.u32 %s508_s26, 4  ;;  %p456_p8 = scmp.ne.s32.totalorder %s584_s1, %s455_s30  ;;  %s29_s27 = int_to_ptr.vmem [resolvable:$true] %s28_s27 }
  0x15   :  { %p459_p9 = scmp.lt.u32.totalorder %s455_s30, %s584_s1 }
  0x17   :  { %p461_p10 = pnand %p459_p9, %p456_p8 }
  0x19   :  { %464 = shalt.err (!%p461_p10)
}
  0x1a   :  { %s465_s8 = scalar_lea.vmem %s29_s27, 8192  ;;  %p470_p12 = scmp.lt.s32.totalorder %s29_s27, %s29_s27 }
  0x1b   :  { %p466_p11 = scmp.ne.s32.totalorder %s29_s27, %s465_s8  ;;  %p471_p13 = scmp.lt.s32.totalorder %s465_s8, %s465_s8 }
  0x1d   :  { %p472_p0 = por %p471_p13, %p470_p12 }
  0x1f   :  { %p473_p1 = pnand %p472_p0, %p466_p11 }
  0x21   :  { %476 = shalt.err (!%p473_p1)
}
  0x22   :  { %34 = dma.hbm_to_vmem [thread:$0]  %s584_s1, 8192, %s29_s27, [#allocation6], %s506_s22, %s506_s22, %s507_s23  }
  0x23   :  { %499 = dma.done.wait [#allocation3], 512  }
  0x24   :  { %500 = vsyncadd [#allocation3], 4294966784 }
  0x25   :  { %501 = dma.done.wait [#allocation6], 8192  }
  0x26   :  { %502 = vsyncadd [#allocation6], 4294959104  ;;  %v48_v0 = vld [vmem:[#allocation5 + $0x8] sm:$0xff]  ;;  %v50_v1 = vld [vmem:[#allocation5 + $0x18] sm:$0xff]  ;;  %vm289_vm0 = vcmask 1041409   ;;  %vm291_vm1 = vcmask 1043459  }
  0x27   :  { %v47_v2 = vld [vmem:[#allocation5] sm:$0xff]  ;;  %v315_v3 = vpack.c.bf16 %v50_v1, %v48_v0  ;;  %v49_v4 = vld [vmem:[#allocation5 + $0x10] sm:$0xff]  ;;  %v52_v5 = vld [vmem:[#allocation5 + $0x28] sm:$0xff]  ;;  %vm293_vm2 = vcmask 1045509   ;;  %vm295_vm3 = vcmask 1047559  }
  0x28   :  { %v54_v6 = vld [vmem:[#allocation5 + $0x38] sm:$0xff]  ;;  %v317_v7 = vpack.c.bf16 %v49_v4, %v47_v2  ;;  %v51_v9 = vld [vmem:[#allocation5 + $0x20] sm:$0xff]  ;;  %v53_v10 = vld [vmem:[#allocation5 + $0x30] sm:$0xff] }
  0x29   :  { %v319_v8 = vpack.c.bf16 %v54_v6, %v52_v5  ;;  %v56_v11 = vld [vmem:[#allocation5 + $0x48] sm:$0xff]  ;;  %379 = vmatprep.subr.bf16.mxu1 %v315_v3  ;;  %316 = vmatprep.subr.bf16.mxu0 %v315_v3  ;;  %v58_v12 = vld [vmem:[#allocation5 + $0x58] sm:$0xff]  ;;  %v321_v13 = vpack.c.bf16 %v53_v10, %v51_v9  ;;  %v55_v15 = vld [vmem:[#allocation5 + $0x40] sm:$0xff] }
  0x2a   :  { %395 = vmatpush1.bf16.msra.mxu1 %v317_v7  ;;  %318 = vmatpush1.bf16.msra.mxu0 %v317_v7  ;;  %v323_v14 = vpack.c.bf16 %v58_v12, %v56_v11  ;;  %v57_v16 = vld [vmem:[#allocation5 + $0x50] sm:$0xff]  ;;  %v60_v17 = vld [vmem:[#allocation5 + $0x68] sm:$0xff]  ;;  %v62_v18 = vld [vmem:[#allocation5 + $0x78] sm:$0xff] }
  0x2b   :  { %380 = vmatprep.subr.bf16.mxu1 %v319_v8  ;;  %320 = vmatprep.subr.bf16.mxu0 %v319_v8  ;;  %v325_v19 = vpack.c.bf16 %v57_v16, %v55_v15  ;;  %v327_v20 = vpack.c.bf16 %v62_v18, %v60_v17  ;;  %v59_v21 = vld [vmem:[#allocation5 + $0x60] sm:$0xff]  ;;  %v61_v22 = vld [vmem:[#allocation5 + $0x70] sm:$0xff]  ;;  %v64_v23 = vld [vmem:[#allocation5 + $0x88] sm:$0xff] }
  0x2c   :  { %v66_v24 = vld [vmem:[#allocation5 + $0x98] sm:$0xff]  ;;  %v329_v25 = vpack.c.bf16 %v61_v22, %v59_v21  ;;  %v63_v27 = vld [vmem:[#allocation5 + $0x80] sm:$0xff]  ;;  %v65_v28 = vld [vmem:[#allocation5 + $0x90] sm:$0xff] }
  0x2d   :  { %v331_v26 = vpack.c.bf16 %v66_v24, %v64_v23  ;;  %v68_v29 = vld [vmem:[#allocation5 + $0xa8] sm:$0xff]  ;;  %v70_v30 = vld [vmem:[#allocation5 + $0xb8] sm:$0xff]  ;;  %v333_v31 = vpack.c.bf16 %v65_v28, %v63_v27  ;;  %v67_v33 = vld [vmem:[#allocation5 + $0xa0] sm:$0xff] }
  0x2e   :  { %396 = vmatpush1.bf16.msra.mxu1 %v321_v13  ;;  %322 = vmatpush1.bf16.msra.mxu0 %v321_v13  ;;  %v335_v32 = vpack.c.bf16 %v70_v30, %v68_v29  ;;  %v69_v34 = vld [vmem:[#allocation5 + $0xb0] sm:$0xff]  ;;  %v72_v35 = vld [vmem:[#allocation5 + $0xc8] sm:$0xff]  ;;  %v74_v36 = vld [vmem:[#allocation5 + $0xd8] sm:$0xff] }
  0x2f   :  { %381 = vmatprep.subr.bf16.mxu1 %v323_v14  ;;  %324 = vmatprep.subr.bf16.mxu0 %v323_v14  ;;  %v337_v37 = vpack.c.bf16 %v69_v34, %v67_v33  ;;  %v339_v38 = vpack.c.bf16 %v74_v36, %v72_v35  ;;  %v71_v39 = vld [vmem:[#allocation5 + $0xc0] sm:$0xff]  ;;  %v73_v40 = vld [vmem:[#allocation5 + $0xd0] sm:$0xff]  ;;  %v555_v41 = vld [vmem:[#allocation2 + $0x18] sm:$0xff]  ;;  %v194_v36 = vlaneseq }
  0x30   :  { %v76_v42 = vld [vmem:[#allocation5 + $0xe8] sm:$0xff]  ;;  %v78_v43 = vld [vmem:[#allocation5 + $0xf8] sm:$0xff]  ;;  %181 = vmatprep.mubr.f32.mxu1 %v555_v41  ;;  %v341_v45 = vpack.c.bf16 %v73_v40, %v71_v39  ;;  %v75_v47 = vld [vmem:[#allocation5 + $0xe0] sm:$0xff] }
  0x31   :  { %v558_v44 = vld [vmem:[#allocation2 + $0x8] sm:$0xff]  ;;  %v343_v46 = vpack.c.bf16 %v78_v43, %v76_v42  ;;  %v77_v48 = vld [vmem:[#allocation5 + $0xf0] sm:$0xff]  ;;  %v82_v50 = vld [vmem:[#allocation5 + $0x118] sm:$0xff]  ;;  %v561_v39 = vshrl.u32 %v194_v36, 7 }
  0x32   :  { %397 = vmatpush1.bf16.msra.mxu1 %v325_v19  ;;  %326 = vmatpush1.bf16.msra.mxu0 %v325_v19  ;;  %v80_v49 = vld [vmem:[#allocation5 + $0x108] sm:$0xff]  ;;  %v345_v51 = vpack.c.bf16 %v77_v48, %v75_v47  ;;  %v79_v53 = vld [vmem:[#allocation5 + $0x100] sm:$0xff]  ;;  %v81_v54 = vld [vmem:[#allocation5 + $0x110] sm:$0xff] }
  0x33   :  { %382 = vmatprep.subr.bf16.mxu1 %v327_v20  ;;  %328 = vmatprep.subr.bf16.mxu0 %v327_v20  ;;  %v347_v52 = vpack.c.bf16 %v82_v50, %v80_v49  ;;  %v84_v55 = vld [vmem:[#allocation5 + $0x128] sm:$0xff]  ;;  %v86_v56 = vld [vmem:[#allocation5 + $0x138] sm:$0xff]  ;;  %v349_v57 = vpack.c.bf16 %v81_v54, %v79_v53  ;;  %v83_v59 = vld [vmem:[#allocation5 + $0x120] sm:$0xff]  ;;  %v196_v43 = vsub.s32 0, %v561_v39 }
  0x34   :  { %175 = vmatprep.mubr.f32.mxu0 %v558_v44  ;;  %v351_v58 = vpack.c.bf16 %v86_v56, %v84_v55  ;;  %v85_v60 = vld [vmem:[#allocation5 + $0x130] sm:$0xff]  ;;  %v88_v61 = vld [vmem:[#allocation5 + $0x148] sm:$0xff]  ;;  %v90_v62 = vld [vmem:[#allocation5 + $0x158] sm:$0xff] }
  0x35   :  { %v353_v63 = vpack.c.bf16 %v85_v60, %v83_v59  ;;  %v355_v0 = vpack.c.bf16 %v90_v62, %v88_v61  ;;  %v87_v1 = vld [vmem:[#allocation5 + $0x140] sm:$0xff]  ;;  %v89_v2 = vld [vmem:[#allocation5 + $0x150] sm:$0xff]  ;;  %v92_v3 = vld [vmem:[#allocation5 + $0x168] sm:$0xff] }
  0x36   :  { %398 = vmatpush1.bf16.msra.mxu1 %v329_v25  ;;  %330 = vmatpush1.bf16.msra.mxu0 %v329_v25  ;;  %v94_v4 = vld [vmem:[#allocation5 + $0x178] sm:$0xff]  ;;  %v357_v5 = vpack.c.bf16 %v89_v2, %v87_v1  ;;  %v91_v7 = vld [vmem:[#allocation5 + $0x160] sm:$0xff]  ;;  %v93_v8 = vld [vmem:[#allocation5 + $0x170] sm:$0xff] }
  0x37   :  { %383 = vmatprep.subr.bf16.mxu1 %v331_v26  ;;  %332 = vmatprep.subr.bf16.mxu0 %v331_v26  ;;  %v359_v6 = vpack.c.bf16 %v94_v4, %v92_v3  ;;  %v96_v9 = vld [vmem:[#allocation5 + $0x188] sm:$0xff]  ;;  %v98_v10 = vld [vmem:[#allocation5 + $0x198] sm:$0xff]  ;;  %v361_v11 = vpack.c.bf16 %v93_v8, %v91_v7  ;;  %v95_v13 = vld [vmem:[#allocation5 + $0x180] sm:$0xff] }
  0x38   :  { %v363_v12 = vpack.c.bf16 %v98_v10, %v96_v9  ;;  %v97_v14 = vld [vmem:[#allocation5 + $0x190] sm:$0xff]  ;;  %v100_v15 = vld [vmem:[#allocation5 + $0x1a8] sm:$0xff]  ;;  %v102_v16 = vld [vmem:[#allocation5 + $0x1b8] sm:$0xff] }
  0x39   :  { %v365_v17 = vpack.c.bf16 %v97_v14, %v95_v13  ;;  %v367_v18 = vpack.c.bf16 %v102_v16, %v100_v15  ;;  %v99_v19 = vld [vmem:[#allocation5 + $0x1a0] sm:$0xff]  ;;  %v101_v20 = vld [vmem:[#allocation5 + $0x1b0] sm:$0xff]  ;;  %v104_v21 = vld [vmem:[#allocation5 + $0x1c8] sm:$0xff] }
  0x3a   :  { %399 = vmatpush1.bf16.msra.mxu1 %v333_v31  ;;  %334 = vmatpush1.bf16.msra.mxu0 %v333_v31  ;;  %v106_v22 = vld [vmem:[#allocation5 + $0x1d8] sm:$0xff]  ;;  %v369_v23 = vpack.c.bf16 %v101_v20, %v99_v19  ;;  %v103_v25 = vld [vmem:[#allocation5 + $0x1c0] sm:$0xff]  ;;  %v105_v26 = vld [vmem:[#allocation5 + $0x1d0] sm:$0xff] }
  0x3b   :  { %384 = vmatprep.subr.bf16.mxu1 %v335_v32  ;;  %336 = vmatprep.subr.bf16.mxu0 %v335_v32  ;;  %v371_v24 = vpack.c.bf16 %v106_v22, %v104_v21  ;;  %v108_v27 = vld [vmem:[#allocation5 + $0x1e8] sm:$0xff]  ;;  %v110_v28 = vld [vmem:[#allocation5 + $0x1f8] sm:$0xff]  ;;  %v373_v29 = vpack.c.bf16 %v105_v26, %v103_v25  ;;  %v107_v31 = vld [vmem:[#allocation5 + $0x1e0] sm:$0xff] }
  0x3c   :  { %v375_v30 = vpack.c.bf16 %v110_v28, %v108_v27  ;;  %v109_v32 = vld [vmem:[#allocation5 + $0x1f0] sm:$0xff]  ;;  %v43_v35 = vld [vmem:[#allocation2] sm:$0xff] }
  0x3d   :  { %v377_v33 = vpack.c.bf16 %v109_v32, %v107_v31  ;;  %v45_v34 = vld [vmem:[#allocation2 + $0x10] sm:$0xff] }
  0x3e   :  { %400 = vmatpush1.bf16.msra.mxu1 %v337_v37  ;;  %338 = vmatpush1.bf16.msra.mxu0 %v337_v37 }
  0x3f   :  { %385 = vmatprep.subr.bf16.mxu1 %v339_v38  ;;  %340 = vmatprep.subr.bf16.mxu0 %v339_v38 }
  0x42   :  { %401 = vmatpush1.bf16.msra.mxu1 %v341_v45  ;;  %342 = vmatpush1.bf16.msra.mxu0 %v341_v45  ;;  %v192_v45 = vld [vmem:[%s585_s2] sm:$0x3]  ;;  %s510_s2 = smov [#allocation7]  }
  0x43   :  { %386 = vmatprep.subr.bf16.mxu1 %v343_v46  ;;  %344 = vmatprep.subr.bf16.mxu0 %v343_v46  ;;  %v200_v46 = vsub.s32 1, %v561_v39  ;;  %v197_v47 = vrot.slane %v192_v45, %v196_v43  ;;  %s305_s11 = sshll.u32 %s510_s2, 4  ;;  %s306_s11 = int_to_ptr.vmem [resolvable:$true] %s305_s11 }
  0x44   :  { %s477_s12 = scalar_lea.vmem %s306_s11, 64  ;;  %p482_p3 = scmp.lt.s32.totalorder %s306_s11, %s306_s11 }
  0x45   :  { %v201_v48 = vrot.slane %v192_v45, %v200_v46  ;;  %p478_p2 = scmp.ne.s32.totalorder %s306_s11, %s477_s12  ;;  %p483_p4 = scmp.lt.s32.totalorder %s477_s12, %s477_s12 }
  0x46   :  { %402 = vmatpush1.bf16.msra.mxu1 %v345_v51  ;;  %346 = vmatpush1.bf16.msra.mxu0 %v345_v51 }
  0x47   :  { %387 = vmatprep.subr.bf16.mxu1 %v347_v52  ;;  %348 = vmatprep.subr.bf16.mxu0 %v347_v52  ;;  %p484_p5 = por %p483_p4, %p482_p3 }
  0x49   :  { %p485_p6 = pnand %p484_p5, %p478_p2 }
  0x4a   :  { %403 = vmatpush1.bf16.msra.mxu1 %v349_v57  ;;  %350 = vmatpush1.bf16.msra.mxu0 %v349_v57 }
  0x4b   :  { %388 = vmatprep.subr.bf16.mxu1 %v351_v58  ;;  %352 = vmatprep.subr.bf16.mxu0 %v351_v58 }
  0x4e   :  { %404 = vmatpush1.bf16.msra.mxu1 %v353_v63  ;;  %354 = vmatpush1.bf16.msra.mxu0 %v353_v63 }
  0x4f   :  { %389 = vmatprep.subr.bf16.mxu1 %v355_v0  ;;  %356 = vmatprep.subr.bf16.mxu0 %v355_v0 }
  0x52   :  { %405 = vmatpush1.bf16.msra.mxu1 %v357_v5  ;;  %358 = vmatpush1.bf16.msra.mxu0 %v357_v5 }
  0x53   :  { %390 = vmatprep.subr.bf16.mxu1 %v359_v6  ;;  %360 = vmatprep.subr.bf16.mxu0 %v359_v6 }
  0x56   :  { %406 = vmatpush1.bf16.msra.mxu1 %v361_v11  ;;  %362 = vmatpush1.bf16.msra.mxu0 %v361_v11 }
  0x57   :  { %391 = vmatprep.subr.bf16.mxu1 %v363_v12  ;;  %364 = vmatprep.subr.bf16.mxu0 %v363_v12 }
  0x5a   :  { %407 = vmatpush1.bf16.msra.mxu1 %v365_v17  ;;  %366 = vmatpush1.bf16.msra.mxu0 %v365_v17 }
  0x5b   :  { %392 = vmatprep.subr.bf16.mxu1 %v367_v18  ;;  %368 = vmatprep.subr.bf16.mxu0 %v367_v18 }
  0x5e   :  { %408 = vmatpush1.bf16.msra.mxu1 %v369_v23  ;;  %370 = vmatpush1.bf16.msra.mxu0 %v369_v23 }
  0x5f   :  { %393 = vmatprep.subr.bf16.mxu1 %v371_v24  ;;  %372 = vmatprep.subr.bf16.mxu0 %v371_v24 }
  0x62   :  { %409 = vmatpush1.bf16.msra.mxu1 %v373_v29  ;;  %374 = vmatpush1.bf16.msra.mxu0 %v373_v29  ;;  %v509_v29 = vmov 1983009808  }
  0x63   :  { %394 = vmatprep.subr.bf16.mxu1 %v375_v30  ;;  %376 = vmatprep.subr.bf16.mxu0 %v375_v30  ;;  %v270_v30 = vunpack.c.l.s4 %v509_v29 }
  0x66   :  { %410 = vmatpush1.bf16.msra.mxu1 %v377_v33  ;;  %378 = vmatpush1.bf16.msra.mxu0 %v377_v33 }
  0x69   :  { %182 = vmatmul.mubr.f32.vlgmr.msra.gmra.mrb[0].mxu1 %v45_v34  ;;  %176 = vmatmul.mubr.f32.vlgmr.msra.gmra.mrb[0].mxu0 %v43_v35 }
 0x13c   :  { %v183_v37 = vpop.f32.mrb[0].mxu1  ;;  %v177_v38 = vpop.f32.mrb[0].mxu0 }
 0x13d   :  { %417 = vtanh.f32 %v183_v37  ;;  %v185_v40 = vpop.f32.mrb[1].mxu1  ;;  %v179_v42 = vpop.f32.mrb[1].mxu0 }
 0x13e   :  { %419 = vtanh.f32 %v185_v40 }
 0x13f   :  { %421 = vtanh.f32 %v177_v38 }
 0x140   :  { %423 = vtanh.f32 %v179_v42 }
 0x147   :  { %v418_v49 = vpop.eup %417 }
 0x148   :  { %v420_v50 = vpop.eup %419  ;;  %v206_v51 = vmul.f32 %v418_v49, %v197_v47 }
 0x149   :  { %v422_v52 = vpop.eup %421  ;;  %v207_v53 = vmul.f32 %v420_v50, %v201_v48 }
 0x14a   :  { %v424_v54 = vpop.eup %423  ;;  %v204_v55 = vmul.f32 %v422_v52, %v197_v47 }
 0x14b   :  { %v211_v56 = vadd.f32 %v207_v53, %v206_v51  ;;  %v205_v57 = vmul.f32 %v424_v54, %v201_v48 }
 0x14d   :  { %212 = vadd.xlane.f32.xlu0 %v211_v56  ;;  %v208_v58 = vadd.f32 %v205_v57, %v204_v55 }
 0x151   :  { %209 = vadd.xlane.f32.xlu0 %v208_v58 }
 0x1da   :  { %v213_v59 = vpop.xlane.xlu0 %212 }
 0x1db   :  { %v216_v60 = vmul.f32 1.442695, %v213_v59 }
 0x1dd   :  { %425 = vpow2.f32 %v216_v60 }
 0x1de   :  { %v210_v61 = vpop.xlane.xlu0 %209 }
 0x1df   :  { %v214_v62 = vmul.f32 1.442695, %v210_v61 }
 0x1e1   :  { %427 = vpow2.f32 %v214_v62 }
 0x1e7   :  { %v426_v63 = vpop.eup %425 }
 0x1e8   :  { %v224_v0 = vrot.slane %v426_v63, 4  ;;  %v232_v1 = vmul.f32 %v426_v63, %v45_v34  ;;  %v233_v2 = vmul.f32 %v426_v63, %v555_v41 }
 0x1ea   :  { %v225_v3 = vadd.f32 %v426_v63, %v224_v0  ;;  %v246_v4 = vrot.slane %v232_v1, 4  ;;  %v252_v5 = vrot.slane %v233_v2, 4 }
 0x1eb   :  { %v428_v6 = vpop.eup %427 }
 0x1ec   :  { %v218_v7 = vrot.slane %v428_v6, 4  ;;  %v226_v8 = vrot.slane %v225_v3, 2  ;;  %v230_v9 = vmul.f32 %v428_v6, %v43_v35  ;;  %v231_v10 = vmul.f32 %v428_v6, %v558_v44 }
 0x1ed   :  { %v247_v11 = vadd.f32 %v246_v4, %v232_v1  ;;  %v253_v12 = vadd.f32 %v252_v5, %v233_v2  ;;  %v271_v35 = vunpack.c.0.s8 %v270_v30 }
 0x1ee   :  { %v219_v13 = vadd.f32 %v428_v6, %v218_v7  ;;  %v227_v14 = vadd.f32 %v226_v8, %v225_v3  ;;  %v234_v15 = vrot.slane %v230_v9, 4  ;;  %v240_v16 = vrot.slane %v231_v10, 4 }
 0x1ef   :  { %v248_v41 = vrot.slane %v247_v11, 2  ;;  %v254_v21 = vrot.slane %v253_v12, 2  ;;  %v274_v46 = vsub.s32 %v271_v35, %v561_v39 }
 0x1f0   :  { %v220_v17 = vrot.slane %v219_v13, 2  ;;  %v228_v18 = vrot.slane %v227_v14, 1  ;;  %v235_v19 = vadd.f32 %v234_v15, %v230_v9  ;;  %v241_v20 = vadd.f32 %v240_v16, %v231_v10 }
 0x1f1   :  { %v249_v27 = vadd.f32 %v248_v41, %v247_v11  ;;  %v255_v44 = vadd.f32 %v254_v21, %v253_v12 }
 0x1f2   :  { %v221_v22 = vadd.f32 %v220_v17, %v219_v13  ;;  %v229_v23 = vadd.f32 %v228_v18, %v227_v14  ;;  %v236_v25 = vrot.slane %v235_v19, 2  ;;  %v242_v26 = vrot.slane %v241_v20, 2 }
 0x1f3   :  { %v250_v33 = vrot.slane %v249_v27, 1  ;;  %v256_v34 = vrot.slane %v255_v44, 1 }
 0x1f4   :  { %v222_v24 = vrot.slane %v221_v22, 1  ;;  %429 = vrcp.f32 %v229_v23  ;;  %v237_v31 = vadd.f32 %v236_v25, %v235_v19  ;;  %v243_v32 = vadd.f32 %v242_v26, %v241_v20 }
 0x1f5   :  { %v251_v38 = vadd.f32 %v250_v33, %v249_v27  ;;  %v257_v40 = vadd.f32 %v256_v34, %v255_v44 }
 0x1f6   :  { %v223_v28 = vadd.f32 %v222_v24, %v221_v22  ;;  %v238_v36 = vrot.slane %v237_v31, 1  ;;  %v244_v37 = vrot.slane %v243_v32, 1 }
 0x1f8   :  { %431 = vrcp.f32 %v223_v28  ;;  %v239_v47 = vadd.f32 %v238_v36, %v237_v31  ;;  %v245_v48 = vadd.f32 %v244_v37, %v243_v32 }
 0x1fe   :  { %v430_v42 = vpop.eup %429 }
 0x1ff   :  { %v262_v43 = vmul.f32 %v430_v42, %v251_v38  ;;  %v263_v45 = vmul.f32 %v430_v42, %v257_v40 }
 0x201   :  { %v276_v49 = vcombine.low %v262_v43, %v263_v45 }
 0x202   :  { %v432_v50 = vpop.eup %431 }
 0x203   :  { %v259_v51 = vmul.f32 %v432_v50, %v239_v47  ;;  %v260_v52 = vmul.f32 %v432_v50, %v245_v48  ;;  %v283_v53 = vrot.slane %v276_v49, %v274_v46 }
 0x205   :  { %v268_v54 = vcombine.low %v259_v51, %v260_v52  ;;  %v288_v56 = vrot.slane %v283_v53, 7 }
 0x207   :  { %v275_v55 = vrot.slane %v268_v54, %v274_v46 }
 0x209   :  { %v290_v57 = vsel %vm289_vm0, %v288_v56, %v275_v55 }
 0x20a   :  { %v292_v58 = vsel %vm291_vm1, %v288_v56, %v290_v57 }
 0x20b   :  { %v294_v59 = vsel %vm293_vm2, %v288_v56, %v292_v58 }
 0x20c   :  { %v296_v39 = vsel %vm295_vm3, %v288_v56, %v294_v59 }
 0x20d   :  { %298 = vst [vmem:[#allocation7] sm:$0xf] %v296_v39 }
 0x20e   :  { %488 = shalt.err (!%p485_p6)
}
 0x20f   :  { %s489_s15 = scalar_lea.hbm %s586_s3, 64 }
 0x210   :  { %p490_p7 = scmp.ne.s32.totalorder %s586_s3, %s489_s15  ;;  %p493_p8 = scmp.lt.u32.totalorder %s489_s15, %s586_s3 }
 0x212   :  { %p495_p9 = pnand %p493_p8, %p490_p7 }
 0x214   :  { %498 = shalt.err (!%p495_p9)
}
 0x215   :  { %308 = dma.vmem_to_hbm [thread:$0]  %s306_s11, 64, %s586_s3, [#allocation4]  }
 0x216   :  { %503 = dma.done.wait [#allocation4], 64  }
 0x217   :  { %504 = vsyncadd [#allocation4], 4294967232 }
 0x218   :  { %312 = vsyncpa [#allocation3], 1 }
 0x219   :  { %313 = vsyncpa [#allocation6], 1 }
 0x21a   :  { %314 = vsyncpa [#allocation4], 1 }

</bundles_post_ra>
